<compile_context>
chip_gen: v6e
topology: v6e:2x2x1
jax: 0.10.0
libtpu: 0.0.40
codegen_flags: <defaults>
</compile_context>

<pallas_src>
import functools

import jax
import jax.numpy as jnp
from jax.experimental import pallas as pl
from jax.experimental.pallas import tpu as pltpu


# ----------------------------------------------------------------------------
# helpers
# ----------------------------------------------------------------------------
def _to_2tuple(v):
    return tuple(v) if isinstance(v, (tuple, list)) else (v, v)


def _ceil_to(x, m):
    return ((x + m - 1) // m) * m


def _num_tensorcores():
    """Best-effort TensorCores-per-chip (v7x=2, v5e/v6e=1). Falls back to 1."""
    try:
        info = pltpu.get_tpu_info()
        for attr in ("num_cores", "num_tensorcores", "tensorcores_per_chip",
                     "cores_per_chip", "core_count"):
            n = getattr(info, attr, None)
            if isinstance(n, int) and n > 0:
                return n
    except Exception:
        pass
    return 1


def _row_tiling(M, num_cores, *, max_tile_single=1024, max_tile_multi=512):
    """Row tile (multiple of 8) and padded row count, generation-aware.

    Single-TC chips: the grid is a serial loop, so never split a problem that
    already fits one tile; allow tiles up to 1024 rows (better roofline).
    Multi-TC chips (v7x): make the grid step count a multiple of num_cores so
    the "parallel" axis gives every TensorCore equal work.
    """
    max_tile = max_tile_multi if num_cores > 1 else max_tile_single
    tm = min(max_tile, _ceil_to(M, 8))
    Mp = _ceil_to(M, tm)
    if num_cores > 1 and M > 8:
        steps = Mp // tm
        if steps % num_cores != 0:
            steps = _ceil_to(steps, num_cores)
            tm = _ceil_to(pl.cdiv(M, steps), 8)
            Mp = _ceil_to(M, tm)
    return tm, Mp


def _vmem_budget_bytes(tm, kp, ep):
    """Double-buffered working set of the pallas_call, in bytes."""
    cols = 2 * tm * kp * 2          # bf16 activation tile
    wgt = 2 * kp * ep * 2           # bf16 weight (pipeline still double-buffers)
    par = 2 * 8 * ep * 4            # (3,Ep) f32 params, padded to 8 sublanes
    out = 2 * tm * ep * 4           # f32 output tile
    return cols + wgt + par + out


# ----------------------------------------------------------------------------
# fused Pallas kernel: (im2col rows) @ W + b  ->  LayerNorm  ->  store
# ----------------------------------------------------------------------------
def _conv_embed_kernel(cols_ref, w_ref, p_ref, o_ref, *, with_norm, eps, e_real):
    """cols:(TM,Kp) bf16, w:(Kp,Ep) bf16, p:(3,Ep) f32 [bias;gamma;beta] -> o:(TM,Ep) f32."""
    acc = jnp.dot(cols_ref[...], w_ref[...],               # bf16 MXU, f32 accumulation
                  preferred_element_type=jnp.float32)
    y = acc + p_ref[0:1, :]                                 # conv bias (0 in padded lanes)
    if with_norm:
        e_pad = y.shape[-1]
        inv_e = 1.0 / e_real                                # explicit real-E divisor
        mean = jnp.sum(y, axis=-1, keepdims=True) * inv_e   # padded lanes are exactly 0
        centered = y - mean
        if e_pad != e_real:                                 # keep pad lanes out of the variance
            lane = jax.lax.broadcasted_iota(jnp.int32, (1, e_pad), 1)
            sq = jnp.where(lane < e_real, centered, 0.0)
        else:
            sq = centered
        var = jnp.sum(sq * sq, axis=-1, keepdims=True) * inv_e   # biased var (PyTorch LN)
        y = centered * jax.lax.rsqrt(var + eps)
        y = y * p_ref[1:2, :] + p_ref[2:3, :]               # gamma/beta (0 in padded lanes)
    o_ref[...] = y.astype(o_ref.dtype)


# ----------------------------------------------------------------------------
# wrapper: ConvEmbed.forward
# ----------------------------------------------------------------------------
def conv_embed_forward(x, params, *, patch_size, stride, padding,
                       with_norm=True, eps=1e-5):
    """x:(B,Cin,H,W) NCHW -> (B,E,Ho,Wo), matching ConvEmbed.forward."""
    B, Cin, H, W = x.shape
    KH, KW = _to_2tuple(patch_size)
    w = params["proj_w"]                                    # (E, Cin, KH, KW) torch layout
    b = params["proj_b"]                                    # (E,)
    E = w.shape[0]

    # --- plain-JAX glue: one NCHW->NHWC layout change + bf16 im2col ----------
    # bf16 here halves the dominant HBM stream (the M x K cols array written by
    # XLA and read once by the kernel); the MXU ran bf16 already, so numerics
    # are unchanged and the per-tile in-kernel cast disappears.
    xn = jnp.transpose(x, (0, 2, 3, 1)).astype(jnp.bfloat16)
    xp = jnp.pad(xn, ((0, 0), (padding, padding), (padding, padding), (0, 0)))
    Ho = (H + 2 * padding - KH) // stride + 1
    Wo = (W + 2 * padding - KW) // stride + 1
    taps = [xp[:, i:i + stride * Ho:stride, j:j + stride * Wo:stride, :]
            for i in range(KH) for j in range(KW)]
    # (B,Ho,Wo,KH*KW,Cin) -> (B*Ho*Wo, KH*KW*Cin); tap-major, channel-minor
    cols = jnp.stack(taps, axis=3).reshape(B * Ho * Wo, KH * KW * Cin)
    # TODO(synk): for production image sizes, gather the KH*KW taps inside the
    # kernel (memory_space=pl.ANY + strided pl.ds / make_async_copy into VMEM
    # scratch) instead of materializing the ~(k/stride)^2-amplified cols in HBM.

    M, Kc = cols.shape
    Kp = _ceil_to(Kc, 128)              # full-vreg, unmasked contraction loads
    Ep = _ceil_to(E, 128)               # lane-dense output stores even when E < 128

    num_cores = _num_tensorcores()
    tm, Mp = _row_tiling(M, num_cores)
    cols = jnp.pad(cols, ((0, Mp - M), (0, Kp - Kc)))

    # conv weight -> matmul weight with matching (tap, cin) ordering; bf16, zero-padded
    wmat = w.transpose(2, 3, 1, 0).reshape(Kc, E).astype(jnp.bfloat16)
    wmat = jnp.pad(wmat, ((0, Kp - Kc), (0, Ep - E)))

    if with_norm:
        g, beta = params["norm_g"], params["norm_b"]
    else:
        g = jnp.ones((E,), jnp.float32)
        beta = jnp.zeros((E,), jnp.float32)
    # pack bias / gamma / beta into one (3, Ep) f32 input -> single DMA descriptor
    pvec = jnp.stack([b.astype(jnp.float32), g.astype(jnp.float32),
                      beta.astype(jnp.float32)], axis=0)
    pvec = jnp.pad(pvec, ((0, 0), (0, Ep - E)))

    vmem_limit = int(min(64 << 20,
                         max(16 << 20, _vmem_budget_bytes(tm, Kp, Ep) + (4 << 20))))

    out = pl.pallas_call(
        functools.partial(_conv_embed_kernel,
                          with_norm=with_norm, eps=eps, e_real=E),
        out_shape=jax.ShapeDtypeStruct((Mp, Ep), jnp.float32),
        grid=(Mp // tm,),
        in_specs=[
            pl.BlockSpec((tm, Kp), lambda i: (i, 0)),       # bf16 im2col rows (row-tiled)
            pl.BlockSpec((Kp, Ep), lambda i: (0, 0)),       # bf16 weight, resident
            pl.BlockSpec((3, Ep), lambda i: (0, 0)),        # [bias; gamma; beta]
        ],
        out_specs=pl.BlockSpec((tm, Ep), lambda i: (i, 0)),  # lane-dense output
        compiler_params=pltpu.CompilerParams(
            dimension_semantics=("parallel",),
            vmem_limit_bytes=vmem_limit),
    )(cols, wmat, pvec)

    tokens = out[:M, :E]                                     # drop row/lane padding
    # TODO(synk): CvT's next op consumes (b, hw, c); returning tokens here (or a
    # bf16/NHWC output) would skip this NCHW transpose round trip entirely. Kept
    # to match the PyTorch module's forward signature exactly.
    return tokens.reshape(B, Ho, Wo, E).transpose(0, 3, 1, 2)


# ----------------------------------------------------------------------------
# pure-JAX reference (f32, highest precision) for a numerics sanity check
# ----------------------------------------------------------------------------
def conv_embed_reference(x, params, *, patch_size, stride, padding,
                         with_norm=True, eps=1e-5):
    y = jax.lax.conv_general_dilated(
        x, params["proj_w"], window_strides=(stride, stride),
        padding=((padding, padding), (padding, padding)),
        dimension_numbers=("NCHW", "OIHW", "NCHW"),
        precision=jax.lax.Precision.HIGHEST)
    y = y + params["proj_b"][None, :, None, None]
    B, C, Ho, Wo = y.shape
    t = y.transpose(0, 2, 3, 1).reshape(B, Ho * Wo, C)
    if with_norm:
        mean = jnp.mean(t, axis=-1, keepdims=True)
        var = jnp.mean((t - mean) ** 2, axis=-1, keepdims=True)
        t = (t - mean) * jax.lax.rsqrt(var + eps)
        t = t * params["norm_g"] + params["norm_b"]
    return t.reshape(B, Ho, Wo, C).transpose(0, 3, 1, 2)


# ----------------------------------------------------------------------------
# main
# ----------------------------------------------------------------------------
if __name__ == "__main__":
    # ConvEmbed defaults: patch_size=7, in_chans=3, embed_dim=64, stride=4, pad=2.
    # embed_dim=64 (< 128) exercises the lane-padded output + masked-LN path.
    patch_size, stride, padding = 7, 4, 2
    in_chans, embed_dim = 3, 64
    B, H, W = 2, 16, 16

    root = jax.random.PRNGKey(0)
    kx, kw, kb = jax.random.split(root, 3)
    x = jax.random.normal(kx, (B, in_chans, H, W), jnp.float32)
    params = {
        "proj_w": jax.random.truncated_normal(
            kw, -2.0, 2.0, (embed_dim, in_chans, patch_size, patch_size),
            jnp.float32) * 0.02,
        "proj_b": jax.random.normal(kb, (embed_dim,), jnp.float32) * 0.02,
        "norm_g": jnp.ones((embed_dim,), jnp.float32),   # nn.LayerNorm init
        "norm_b": jnp.zeros((embed_dim,), jnp.float32),
    }

    fwd = jax.jit(functools.partial(
        conv_embed_forward, patch_size=patch_size, stride=stride,
        padding=padding, with_norm=True))
    out = jax.block_until_ready(fwd(x, params))

    Ho = (H + 2 * padding - patch_size) // stride + 1
    Wo = (W + 2 * padding - patch_size) // stride + 1
    assert out.shape == (B, embed_dim, Ho, Wo), out.shape
    assert bool(jnp.all(jnp.isfinite(out)))

    ref = conv_embed_reference(x, params, patch_size=patch_size, stride=stride,
                               padding=padding, with_norm=True)
    max_err = float(jnp.max(jnp.abs(out - ref)))
    assert max_err < 5e-2, f"max abs error vs reference: {max_err}"

    print("KERNEL_OK")
</pallas_src>

<mosaic_0001>
module attributes {stable_mosaic.version = 11 : i64} {
  func.func @_conv_embed_kernel(%arg0: i32, %arg1: memref<32x256xbf16, #tpu.memory_space<vmem>>, %arg2: memref<256x128xbf16, #tpu.memory_space<vmem>>, %arg3: memref<3x128xf32, #tpu.memory_space<vmem>>, %arg4: memref<32x128xf32, #tpu.memory_space<vmem>>) attributes {dimension_semantics = [#tpu.dimension_semantics<parallel>], iteration_bounds = array<i64: 1>, scalar_prefetch = 0 : i64, scratch_operands = 0 : i64, tpu.core_type = #tpu.core_type<tc>, window_params = [{transform_indices = @transform_0, window_bounds = array<i64: 32, 256>}, {pipeline_mode = #tpu.pipeline_mode<synchronous>, transform_indices = @transform_1, window_bounds = array<i64: 256, 128>}, {pipeline_mode = #tpu.pipeline_mode<synchronous>, transform_indices = @transform_2, window_bounds = array<i64: 3, 128>}, {transform_indices = @transform_3, window_bounds = array<i64: 32, 128>}]} {
    %c0 = arith.constant 0 : index
    %c0_0 = arith.constant 0 : index
    %0 = vector.load %arg1[%c0, %c0_0] : memref<32x256xbf16, #tpu.memory_space<vmem>>, vector<32x256xbf16>
    %c0_1 = arith.constant 0 : index
    %c0_2 = arith.constant 0 : index
    %1 = vector.load %arg2[%c0_1, %c0_2] : memref<256x128xbf16, #tpu.memory_space<vmem>>, vector<256x128xbf16>
    %cst = arith.constant dense<0.000000e+00> : vector<32x128xf32>
    %2 = tpu.matmul %0, %1, %cst {dimension_numbers = #tpu.dot_dimension_numbers<[1], [0], [0], [1], [0, 0, 1, 1], [], []>} : vector<32x256xbf16>, vector<256x128xbf16>, vector<32x128xf32> -> vector<32x128xf32>
    %c0_3 = arith.constant 0 : index
    %c0_4 = arith.constant 0 : index
    %3 = vector.load %arg3[%c0_3, %c0_4] : memref<3x128xf32, #tpu.memory_space<vmem>>, vector<1x128xf32>
    %4 = vector.broadcast %3 : vector<1x128xf32> to vector<32x128xf32>
    %5 = arith.addf %2, %4 : vector<32x128xf32>
    %cst_5 = arith.constant dense<0.000000e+00> : vector<32xf32>
    %6 = vector.multi_reduction <add>, %5, %cst_5 [1] : vector<32x128xf32> to vector<32xf32>
    %7 = vector.shape_cast %6 : vector<32xf32> to vector<32x1xf32>
    %cst_6 = arith.constant 1.562500e-02 : f32
    %8 = vector.broadcast %cst_6 : f32 to vector<32x1xf32>
    %9 = arith.mulf %7, %8 : vector<32x1xf32>
    %10 = vector.broadcast %9 : vector<32x1xf32> to vector<32x128xf32>
    %11 = arith.subf %5, %10 : vector<32x128xf32>
    %12 = tpu.iota {dimensions = array<i32: 1>} : vector<1x128xi32>
    %c64_i32 = arith.constant 64 : i32
    %13 = vector.broadcast %c64_i32 : i32 to vector<1x128xi32>
    %14 = arith.cmpi slt, %12, %13 : vector<1x128xi32>
    %cst_7 = arith.constant 0.000000e+00 : f32
    %15 = vector.shape_cast %14 : vector<1x128xi1> to vector<1x128xi1>
    %16 = vector.broadcast %15 : vector<1x128xi1> to vector<32x128xi1>
    %17 = vector.broadcast %cst_7 : f32 to vector<32x128xf32>
    %18 = arith.select %16, %11, %17 : vector<32x128xi1>, vector<32x128xf32>
    %19 = arith.mulf %18, %18 : vector<32x128xf32>
    %cst_8 = arith.constant dense<0.000000e+00> : vector<32xf32>
    %20 = vector.multi_reduction <add>, %19, %cst_8 [1] : vector<32x128xf32> to vector<32xf32>
    %21 = vector.shape_cast %20 : vector<32xf32> to vector<32x1xf32>
    %cst_9 = arith.constant 1.562500e-02 : f32
    %22 = vector.broadcast %cst_9 : f32 to vector<32x1xf32>
    %23 = arith.mulf %21, %22 : vector<32x1xf32>
    %cst_10 = arith.constant 9.99999974E-6 : f32
    %24 = vector.broadcast %cst_10 : f32 to vector<32x1xf32>
    %25 = arith.addf %23, %24 : vector<32x1xf32>
    %26 = math.rsqrt %25 : vector<32x1xf32>
    %27 = vector.broadcast %26 : vector<32x1xf32> to vector<32x128xf32>
    %28 = arith.mulf %11, %27 : vector<32x128xf32>
    %c1 = arith.constant 1 : index
    %c0_11 = arith.constant 0 : index
    %29 = vector.load %arg3[%c1, %c0_11] : memref<3x128xf32, #tpu.memory_space<vmem>>, vector<1x128xf32>
    %30 = vector.broadcast %29 : vector<1x128xf32> to vector<32x128xf32>
    %31 = arith.mulf %28, %30 : vector<32x128xf32>
    %c2 = arith.constant 2 : index
    %c0_12 = arith.constant 0 : index
    %32 = vector.load %arg3[%c2, %c0_12] : memref<3x128xf32, #tpu.memory_space<vmem>>, vector<1x128xf32>
    %33 = vector.broadcast %32 : vector<1x128xf32> to vector<32x128xf32>
    %34 = arith.addf %31, %33 : vector<32x128xf32>
    %c0_13 = arith.constant 0 : index
    %c0_14 = arith.constant 0 : index
    %35 = vector.load %arg4[%c0_13, %c0_14] : memref<32x128xf32, #tpu.memory_space<vmem>>, vector<32x128xf32>
    tpu.vector_store %arg4[%c0_13, %c0_14], %34 {strides = array<i32>} : memref<32x128xf32, #tpu.memory_space<vmem>>, vector<32x128xf32>,
    return
  }
  func.func @transform_0(%arg0: i32) -> (i32, i32) {
    %c0_i32 = arith.constant 0 : i32
    %c0_i32_0 = arith.constant 0 : i32
    return %arg0, %c0_i32 : i32, i32
  }
  func.func @transform_1(%arg0: i32) -> (i32, i32) {
    %c0_i32 = arith.constant 0 : i32
    %c0_i32_0 = arith.constant 0 : i32
    %c0_i32_1 = arith.constant 0 : i32
    return %c0_i32, %c0_i32_0 : i32, i32
  }
  func.func @transform_2(%arg0: i32) -> (i32, i32) {
    %c0_i32 = arith.constant 0 : i32
    %c0_i32_0 = arith.constant 0 : i32
    %c0_i32_1 = arith.constant 0 : i32
    return %c0_i32, %c0_i32_0 : i32, i32
  }
  func.func @transform_3(%arg0: i32) -> (i32, i32) {
    %c0_i32 = arith.constant 0 : i32
    %c0_i32_0 = arith.constant 0 : i32
    return %arg0, %c0_i32 : i32, i32
  }
}

</mosaic_0001>

<bundles_post_ra>
// kernel: conv_embed_forward.1
= control target key start
LH: loop header
LB: loop body
LE: loop exit
PB: predicated region body
PF: predicated region fallthrough
CT: control target
= control target key end

     0   :  { %s534_s0 = inlined_call_operand.vmem [shape: bf16[32,256], index: 0, kind: input, shape index: {}]   ;;  %s535_s1 = inlined_call_operand.vmem [shape: bf16[256,128], index: 1, kind: input, shape index: {}]   ;;  %s536_s2 = inlined_call_operand.vmem [shape: f32[3,128], index: 2, kind: input, shape index: {}]   ;;  %s537_s3 = inlined_call_operand.hbm [shape: f32[32,128], index: 3, kind: output, shape index: {}]  }
   0x1   :  { %v383_v0 = vld [vmem:[%s535_s1 + $0x78] sm:$0xff]   ;;  %v385_v2 = vld [vmem:[%s535_s1 + $0x70] sm:$0xff]   ;;  %v387_v4 = vld [vmem:[%s535_s1 + $0x68] sm:$0xff]  }
   0x2   :  { %v384_v1 = vld [vmem:[%s535_s1 + $0x38] sm:$0xff]   ;;  %336 = vmatprep.subr.bf16.mxu0 %v383_v0  ;;  %364 = vmatprep.subr.bf16.mxu1 %v383_v0  ;;  %v386_v3 = vld [vmem:[%s535_s1 + $0x30] sm:$0xff]   ;;  %v388_v5 = vld [vmem:[%s535_s1 + $0x28] sm:$0xff]  }
   0x3   :  { %337 = vmatpush3.bf16.msra.mxu0 %v384_v1  ;;  %372 = vmatpush3.bf16.msra.mxu1 %v384_v1  ;;  %v389_v6 = vld [vmem:[%s535_s1 + $0x60] sm:$0xff]   ;;  %v391_v8 = vld [vmem:[%s535_s1 + $0x58] sm:$0xff]   ;;  %v393_v10 = vld [vmem:[%s535_s1 + $0x50] sm:$0xff]  }
   0x4   :  { %338 = vmatprep.subr.bf16.mxu0 %v385_v2  ;;  %365 = vmatprep.subr.bf16.mxu1 %v385_v2  ;;  %v390_v7 = vld [vmem:[%s535_s1 + $0x20] sm:$0xff]   ;;  %v392_v9 = vld [vmem:[%s535_s1 + $0x18] sm:$0xff]  }
   0x5   :  { %v401_v11 = vld [vmem:[%s534_s0 + $0x4] ss:$8 sps:$4 sm:$0xff]   ;;  %v404_v12 = vld [vmem:[%s534_s0 + $0x14] ss:$8 sps:$4 sm:$0xff]  }
   0x7   :  { %339 = vmatpush3.bf16.msra.mxu0 %v386_v3  ;;  %373 = vmatpush3.bf16.msra.mxu1 %v386_v3 }
   0x8   :  { %340 = vmatprep.subr.bf16.mxu0 %v387_v4  ;;  %366 = vmatprep.subr.bf16.mxu1 %v387_v4 }
   0xb   :  { %341 = vmatpush3.bf16.msra.mxu0 %v388_v5  ;;  %374 = vmatpush3.bf16.msra.mxu1 %v388_v5 }
   0xc   :  { %342 = vmatprep.subr.bf16.mxu0 %v389_v6  ;;  %367 = vmatprep.subr.bf16.mxu1 %v389_v6 }
   0xf   :  { %343 = vmatpush3.bf16.msra.mxu0 %v390_v7  ;;  %375 = vmatpush3.bf16.msra.mxu1 %v390_v7 }
  0x10   :  { %344 = vmatprep.subr.bf16.mxu0 %v391_v8  ;;  %368 = vmatprep.subr.bf16.mxu1 %v391_v8 }
  0x11   :  { %8 = vsyncpa [#allocation3], 0  ;;  %v394_v13 = vld [vmem:[%s535_s1 + $0x10] sm:$0xff]   ;;  %v395_v14 = vld [vmem:[%s535_s1 + $0x48] sm:$0xff]   ;;  %205 = vmatprep.mubr.bf16.mxu0 %v401_v11  ;;  %213 = vmatprep.mubr.bf16.mxu1 %v404_v12  ;;  %v238_v37 = vlaneseq  ;;  %s435_s29 = smov [#allocation2]  }
  0x12   :  { %v396_v15 = vld [vmem:[%s535_s1 + $0x8] sm:$0xff]   ;;  %v397_v16 = vld [vmem:[%s535_s1 + $0x40] sm:$0xff]   ;;  %v402_v19 = vld [vmem:[%s534_s0 + $0x10] ss:$8 sps:$4 sm:$0xff]   ;;  %s302_s30 = sshll.u32 %s435_s29, 4  ;;  %s303_s30 = int_to_ptr.vmem [resolvable:$true] %s302_s30 }
  0x13   :  { %345 = vmatpush3.bf16.msra.mxu0 %v392_v9  ;;  %376 = vmatpush3.bf16.msra.mxu1 %v392_v9  ;;  %v398_v17 = vld [vmem:[%s535_s1] sm:$0xff]   ;;  %v239_v38 = vand.u32 127, %v238_v37  ;;  %p418_p1 = scmp.lt.s32.totalorder %s303_s30, %s303_s30 }
  0x14   :  { %346 = vmatprep.subr.bf16.mxu0 %v393_v10  ;;  %369 = vmatprep.subr.bf16.mxu1 %v393_v10  ;;  %v399_v18 = vld [vmem:[%s534_s0] ss:$8 sps:$4 sm:$0xff]  }
  0x15   :  { %v313_v24 = vld [vmem:[%s536_s2] ss:$0 sm:$0xff]  ;;  %vm240_vm0 = vcmp.lt.s32.totalorder %v239_v38, 64  ;;  %v334_v8 = vld [vmem:[%s536_s2 + $0x1] ss:$0 sm:$0xff] }
  0x16   :  { %v335_v10 = vld [vmem:[%s536_s2 + $0x2] ss:$0 sm:$0xff]  ;;  %s413_s2 = scalar_lea.vmem %s303_s30, 512 }
  0x17   :  { %347 = vmatpush3.bf16.msra.mxu0 %v394_v13  ;;  %377 = vmatpush3.bf16.msra.mxu1 %v394_v13  ;;  %p414_p0 = scmp.ne.s32.totalorder %s303_s30, %s413_s2  ;;  %p419_p2 = scmp.lt.s32.totalorder %s413_s2, %s413_s2 }
  0x18   :  { %348 = vmatprep.subr.bf16.mxu0 %v395_v14  ;;  %370 = vmatprep.subr.bf16.mxu1 %v395_v14 }
  0x19   :  { %p420_p3 = por %p419_p2, %p418_p1 }
  0x1b   :  { %349 = vmatpush3.bf16.msra.mxu0 %v396_v15  ;;  %378 = vmatpush3.bf16.msra.mxu1 %v396_v15  ;;  %p421_p4 = pnand %p420_p3, %p414_p0 }
  0x1c   :  { %350 = vmatprep.subr.bf16.mxu0 %v397_v16  ;;  %371 = vmatprep.subr.bf16.mxu1 %v397_v16 }
  0x1f   :  { %351 = vmatpush3.bf16.msra.mxu0 %v398_v17  ;;  %379 = vmatpush3.bf16.msra.mxu1 %v398_v17 }
  0x22   :  { %206 = vmatmul.mubr.bf16.vlgmr.msra.gmra.mxu0 %v399_v18  ;;  %214 = vmatmul.mubr.bf16.vlgmr.msra.gmra.mxu1 %v402_v19 }
  0xe2   :  { %v352_v20 = vpop.f32.mrf.mxu0  ;;  %v358_v21 = vpop.f32.mrf.mxu1 }
  0xe4   :  { %v353_v22 = vpop.f32.mrf.mxu0  ;;  %v359_v23 = vpop.f32.mrf.mxu1 }
  0xe5   :  { %v354_v25 = vadd.f32 %v353_v22, %v352_v20  ;;  %v360_v26 = vadd.f32 %v359_v23, %v358_v21 }
  0xe6   :  { %v355_v27 = vpop.f32.mrf.mxu0  ;;  %v361_v28 = vpop.f32.mrf.mxu1 }
  0xe7   :  { %v216_v29 = vadd.f32 %v360_v26, %v313_v24  ;;  %v208_v30 = vadd.f32 %v354_v25, %v313_v24 }
  0xe8   :  { %v356_v31 = vpop.f32.mrf.mxu0  ;;  %v362_v32 = vpop.f32.mrf.mxu1 }
  0xe9   :  { %v357_v33 = vadd.f32 %v356_v31, %v355_v27  ;;  %v363_v34 = vadd.f32 %v362_v32, %v361_v28  ;;  %226 = vadd.xlane.f32.xlu1 %v216_v29  ;;  %222 = vadd.xlane.f32.xlu0 %v208_v30 }
  0xeb   :  { %v219_v35 = vadd.f32 %v363_v34, %v313_v24  ;;  %v211_v36 = vadd.f32 %v357_v33, %v313_v24 }
  0xed   :  { %228 = vadd.xlane.f32.xlu1 %v219_v35  ;;  %224 = vadd.xlane.f32.xlu0 %v211_v36 }
 0x172   :  { %v227_v39 = vpop.xlane.xlu1 %226  ;;  %v223_v40 = vpop.xlane.xlu0 %222 }
 0x173   :  { %v232_v41 = vmul.f32 0.015625, %v227_v39  ;;  %v230_v42 = vmul.f32 0.015625, %v223_v40 }
 0x175   :  { %v236_v43 = vsub.f32 %v216_v29, %v232_v41  ;;  %v234_v44 = vsub.f32 %v208_v30, %v230_v42 }
 0x176   :  { %v229_v45 = vpop.xlane.xlu1 %228  ;;  %v225_v46 = vpop.xlane.xlu0 %224 }
 0x177   :  { %v233_v47 = vmul.f32 0.015625, %v229_v45  ;;  %v231_v48 = vmul.f32 0.015625, %v225_v46  ;;  %v243_v49 = vsel %vm240_vm0, %v234_v44, 0.0  ;;  %v245_v53 = vsel %vm240_vm0, %v236_v43, 0.0 }
 0x178   :  { %v247_v50 = vmul.f32 %v243_v49, %v243_v49  ;;  %v249_v55 = vmul.f32 %v245_v53, %v245_v53 }
 0x179   :  { %v237_v51 = vsub.f32 %v219_v35, %v233_v47  ;;  %v235_v52 = vsub.f32 %v211_v36, %v231_v48 }
 0x17a   :  { %251 = vadd.xlane.f32.xlu0 %v247_v50 }
 0x17b   :  { %v244_v54 = vsel %vm240_vm0, %v235_v52, 0.0  ;;  %v246_v57 = vsel %vm240_vm0, %v237_v51, 0.0 }
 0x17c   :  { %v248_v56 = vmul.f32 %v244_v54, %v244_v54  ;;  %v250_v58 = vmul.f32 %v246_v57, %v246_v57 }
 0x17e   :  { %255 = vadd.xlane.f32.xlu0 %v249_v55  ;;  %253 = vadd.xlane.f32.xlu1 %v248_v56 }
 0x182   :  { %257 = vadd.xlane.f32.xlu1 %v250_v58 }
 0x203   :  { %v252_v59 = vpop.xlane.xlu0 %251 }
 0x204   :  { %v259_v60 = vmul.f32 0.015625, %v252_v59 }
 0x206   :  { %v263_v61 = vadd.f32 1e-05, %v259_v60 }
 0x207   :  { %v254_v62 = vpop.xlane.xlu1 %253  ;;  %v256_v63 = vpop.xlane.xlu0 %255 }
 0x208   :  { %405 = vrsqrt.f32 %v263_v61  ;;  %v260_v0 = vmul.f32 0.015625, %v254_v62  ;;  %v261_v1 = vmul.f32 0.015625, %v256_v63 }
 0x20a   :  { %v264_v2 = vadd.f32 1e-05, %v260_v0  ;;  %v265_v3 = vadd.f32 1e-05, %v261_v1 }
 0x20b   :  { %v258_v4 = vpop.xlane.xlu1 %257 }
 0x20c   :  { %407 = vrsqrt.f32 %v264_v2  ;;  %v262_v5 = vmul.f32 0.015625, %v258_v4 }
 0x20d   :  { %409 = vrsqrt.f32 %v265_v3 }
 0x20e   :  { %v266_v6 = vadd.f32 1e-05, %v262_v5 }
 0x210   :  { %411 = vrsqrt.f32 %v266_v6 }
 0x215   :  { %v406_v7 = vpop.eup %405 }
 0x216   :  { %v271_v9 = vmul.f32 %v406_v7, %v234_v44 }
 0x218   :  { %v280_v11 = vmul.f32 %v334_v8, %v271_v9 }
 0x219   :  { %v408_v12 = vpop.eup %407 }
 0x21a   :  { %v410_v13 = vpop.eup %409  ;;  %v272_v14 = vmul.f32 %v408_v12, %v235_v52  ;;  %v289_v15 = vadd.f32 %v335_v10, %v280_v11 }
 0x21b   :  { %v273_v16 = vmul.f32 %v410_v13, %v236_v43 }
 0x21c   :  { %v281_v17 = vmul.f32 %v334_v8, %v272_v14  ;;  %293 = vst [vmem:[#allocation2] sm:$0xff] %v289_v15 }
 0x21d   :  { %v412_v18 = vpop.eup %411  ;;  %v282_v19 = vmul.f32 %v334_v8, %v273_v16 }
 0x21e   :  { %v274_v20 = vmul.f32 %v412_v18, %v237_v51  ;;  %v290_v21 = vadd.f32 %v335_v10, %v281_v17 }
 0x21f   :  { %v291_v22 = vadd.f32 %v335_v10, %v282_v19 }
 0x220   :  { %v283_v23 = vmul.f32 %v334_v8, %v274_v20  ;;  %294 = vst [vmem:[#allocation2 + $0x8] sm:$0xff] %v290_v21 }
 0x221   :  { %295 = vst [vmem:[#allocation2 + $0x10] sm:$0xff] %v291_v22 }
 0x222   :  { %v292_v24 = vadd.f32 %v335_v10, %v283_v23 }
 0x224   :  { %296 = vst [vmem:[#allocation2 + $0x18] sm:$0xff] %v292_v24 }
 0x225   :  { %424 = shalt.err (!%p421_p4)
}
 0x226   :  { %s436_s4 = smov 128   ;;  %s437_s5 = smov 8  }
 0x227   :  { %308 = dma.vmem_to_hbm [thread:$0]  %s303_s30, 512, %s537_s3, [#allocation3], %s436_s4, %s436_s4, %s437_s5  }
 0x228   :  { %433 = dma.done.wait [#allocation3], 512  }
 0x229   :  { %434 = vsyncadd [#allocation3], 4294966784 }
 0x22a   :  { %312 = vsyncpa [#allocation3], 1 }

</bundles_post_ra>
